<compile_context>
chip_gen: v6e
topology: v6e:2x2x1
jax: 0.10.0
libtpu: 0.0.40
codegen_flags: <defaults>
</compile_context>

<pallas_src>
import functools

import jax
import jax.numpy as jnp
from jax.experimental import pallas as pl
from jax.experimental.pallas import tpu as pltpu


# ------------------------------------------------------------------ utils ---
def _round_up(x, m):
    return ((x + m - 1) // m) * m


def _pad2d(a, rows, cols):
    r, c = a.shape
    if r == rows and c == cols:
        return a
    return jnp.pad(a, ((0, rows - r), (0, cols - c)))


def _vmem_capacity():
    try:
        return int(pltpu.get_tpu_info().vmem_capacity_bytes)
    except Exception:
        return 64 * 1024 * 1024          # conservative: v7x has 64 MiB/TC


def _vmem_limit(est_bytes):
    cap = _vmem_capacity()
    return int(min(max(2 * est_bytes, 32 * 1024 * 1024), int(0.85 * cap)))


def _pick_tm(m):
    """Row tile that minimizes M padding (adaptive tm from the review)."""
    if m <= 64:
        return _round_up(m, 8)
    best_pad, best_tm = None, None
    for cand in (512, 256, 128, 64):
        mp = _round_up(m, cand)
        if best_pad is None or mp < best_pad:
            best_pad, best_tm = mp, cand
    return best_tm


def _divisor_tile(n_pad):
    """Largest tile in {512,256,128} dividing an already-128-aligned dim."""
    for cand in (512, 256, 128):
        if n_pad % cand == 0:
            return cand
    return 128


# ---------------------------------------------------------------- kernels ---
def _mm_resident_kernel(x_ref, w_ref, o_ref):
    """Single-k fast path: full weight resident, no accumulator scratch."""
    o_ref[...] = jnp.dot(x_ref[...], w_ref[...],
                         preferred_element_type=jnp.float32).astype(o_ref.dtype)


def _mm_resident_bias_kernel(x_ref, w_ref, b_ref, o_ref):
    acc = jnp.dot(x_ref[...], w_ref[...], preferred_element_type=jnp.float32)
    o_ref[...] = (acc + b_ref[...]).astype(o_ref.dtype)


def _mm_tiled_kernel(x_ref, w_ref, o_ref, acc_ref):
    """Fallback 3-D (i, j, k) tiled matmul for weights too big for VMEM."""
    @pl.when(pl.program_id(2) == 0)
    def _():
        acc_ref[...] = jnp.zeros_like(acc_ref)

    acc_ref[...] += jnp.dot(x_ref[...], w_ref[...],
                            preferred_element_type=jnp.float32)

    @pl.when(pl.program_id(2) == pl.num_programs(2) - 1)
    def _():
        o_ref[...] = acc_ref[...].astype(o_ref.dtype)


def _mm_tiled_bias_kernel(x_ref, w_ref, b_ref, o_ref, acc_ref):
    @pl.when(pl.program_id(2) == 0)
    def _():
        acc_ref[...] = jnp.zeros_like(acc_ref)

    acc_ref[...] += jnp.dot(x_ref[...], w_ref[...],
                            preferred_element_type=jnp.float32)

    @pl.when(pl.program_id(2) == pl.num_programs(2) - 1)
    def _():
        o_ref[...] = (acc_ref[...] + b_ref[...]).astype(o_ref.dtype)


def _pool_bias_kernel(x_ref, wp_ref, o_ref, pooled_ref, *, scale):
    """Fused pool(x) @ w_pool: colsum accumulated over row tiles, one dot at end."""
    r = pl.program_id(0)

    @pl.when(r == 0)
    def _():
        pooled_ref[...] = jnp.zeros_like(pooled_ref)

    pooled_ref[...] += jnp.sum(x_ref[...].astype(jnp.float32), axis=0,
                               keepdims=True)

    @pl.when(r == pl.num_programs(0) - 1)
    def _():
        pooled = (pooled_ref[...] * scale).astype(wp_ref.dtype)
        pooled8 = jnp.broadcast_to(pooled, (8, pooled.shape[1]))
        res = jnp.dot(pooled8, wp_ref[...], preferred_element_type=jnp.float32)
        o_ref[...] = res[0:1, :]


# --------------------------------------------------------------- wrappers ---
def _matmul(xn, w_pad, bias=None, out_dtype=None, n_out=None):
    """xn [M, K] @ w_pad [K_pad, N_pad] (bf16, pre-padded) (+ bias [1, N_pad])."""
    if out_dtype is None:
        out_dtype = xn.dtype
    m, k = xn.shape
    k_pad, n_pad = w_pad.shape
    assert k <= k_pad
    if n_out is None:
        n_out = n_pad
    out_isz = jnp.dtype(out_dtype).itemsize

    xb = xn.astype(jnp.bfloat16)           # bf16 MXU operands, f32 accumulation
    has_bias = bias is not None

    cap = _vmem_capacity()
    budget = cap // 2                        # explicit per-generation VMEM budget
    w_bytes = k_pad * n_pad * 2              # resident bf16 weight slab

    tm = _pick_tm(m)

    if w_bytes <= budget:
        # ----------------- weight-resident fast path ------------------------
        def footprint(tm_):
            return (w_bytes + 2 * tm_ * k_pad * 2 + 2 * tm_ * n_pad * out_isz
                    + (2 * n_pad * 4 if has_bias else 0))

        while footprint(tm) > budget and tm > 8:
            tm = max(8, tm // 2)
        m_pad = _round_up(m, tm)
        # v7x megacore: give the parallel axis >= 2 blocks when M allows.
        if m_pad // tm < 2 and tm > 8:
            tm_half = max(8, tm // 2)
            if _round_up(m, tm_half) // tm_half >= 2:
                tm = tm_half
                m_pad = _round_up(m, tm)

        xb_p = _pad2d(xb, m_pad, k_pad)

        in_specs = [pl.BlockSpec((tm, k_pad), lambda i: (i, 0)),
                    pl.BlockSpec((k_pad, n_pad), lambda i: (0, 0))]   # resident W
        operands = [xb_p, w_pad]
        if has_bias:
            in_specs.append(pl.BlockSpec((1, n_pad), lambda i: (0, 0)))  # resident bias
            operands.append(bias)
            kernel = _mm_resident_bias_kernel
        else:
            kernel = _mm_resident_kernel

        flops = 2 * m_pad * k_pad * n_pad
        bytes_accessed = xb_p.size * 2 + w_bytes + m_pad * n_pad * out_isz
        out = pl.pallas_call(
            kernel,
            out_shape=jax.ShapeDtypeStruct((m_pad, n_pad), out_dtype),
            grid=(m_pad // tm,),
            in_specs=in_specs,
            out_specs=pl.BlockSpec((tm, n_pad), lambda i: (i, 0)),
            compiler_params=pltpu.CompilerParams(
                dimension_semantics=("parallel",),
                vmem_limit_bytes=_vmem_limit(footprint(tm))),
            cost_estimate=pl.CostEstimate(flops=flops, transcendentals=0,
                                          bytes_accessed=bytes_accessed),
        )(*operands)
    else:
        # ----------------- general 3-D tiled fallback -----------------------
        tn = _divisor_tile(n_pad)
        tk = _divisor_tile(k_pad)
        m_pad = _round_up(m, tm)
        xb_p = _pad2d(xb, m_pad, k_pad)
        grid = (m_pad // tm, n_pad // tn, k_pad // tk)

        in_specs = [pl.BlockSpec((tm, tk), lambda i, j, kk: (i, kk)),
                    pl.BlockSpec((tk, tn), lambda i, j, kk: (kk, j))]
        operands = [xb_p, w_pad]
        if has_bias:
            in_specs.append(pl.BlockSpec((1, tn), lambda i, j, kk: (0, j)))
            operands.append(bias)
            kernel = _mm_tiled_bias_kernel
        else:
            kernel = _mm_tiled_kernel

        est = 2 * (tm * tk * 2 + tk * tn * 2 + tm * tn * out_isz) + tm * tn * 4
        flops = 2 * m_pad * k_pad * n_pad
        bytes_accessed = (xb_p.size * 2 * (n_pad // tn)
                          + w_bytes * (m_pad // tm)
                          + m_pad * n_pad * out_isz)
        out = pl.pallas_call(
            kernel,
            out_shape=jax.ShapeDtypeStruct((m_pad, n_pad), out_dtype),
            grid=grid,
            in_specs=in_specs,
            out_specs=pl.BlockSpec((tm, tn), lambda i, j, kk: (i, j)),
            scratch_shapes=[pltpu.VMEM((tm, tn), jnp.float32)],
            compiler_params=pltpu.CompilerParams(
                dimension_semantics=("parallel", "parallel", "arbitrary"),
                vmem_limit_bytes=_vmem_limit(est)),
            cost_estimate=pl.CostEstimate(flops=flops, transcendentals=0,
                                          bytes_accessed=bytes_accessed),
        )(*operands)

    if m_pad != m:
        out = out[:m]
    if n_out != n_pad:
        out = out[:, :n_out]
    return out


# ------------------------------------------------------- module equivalent --
class WeightPallas:
    """JAX/Pallas equivalent of _Weight (ord_in == 1 only, like the original)."""

    def __init__(self, ord_in, ord_out, dim_in, dim_out, cfg='default',
                 normalize=False, *, key):
        assert cfg in ('default', 'light')
        if ord_in != 1:
            raise NotImplementedError('This extension is only for 1->k-uniform')
        self.ord_in = ord_in
        self.ord_out = ord_out
        self.dim_in = dim_in
        self.dim_out = dim_out
        self.cfg = cfg
        self.normalize = normalize
        n_w = {'default': ord_out + 1, 'light': ord_out}[cfg]
        # xavier_normal_: std = sqrt(2 / (fan_in + fan_out))
        fan_in, fan_out = dim_in * n_w, dim_out
        std = (2.0 / (fan_in + fan_out)) ** 0.5
        # f32 master weight (kept for the reference check).
        self.weight = std * jax.random.normal(key, (fan_in, fan_out),
                                              dtype=jnp.float32)
        # Slice ONCE, cast to bf16 ONCE, pre-pad to 128-aligned slabs ONCE
        # (no per-call jnp.pad of the weight).
        if cfg == 'default':
            w_nonpool = self.weight[:-dim_in]      # [ord_out*dim_in, dim_out]
            w_pool = self.weight[-dim_in:]         # [dim_in, dim_out]
        else:
            w_nonpool = self.weight
            w_pool = None
        self.n_pad = _round_up(dim_out, 128)
        self.k_pad = _round_up(w_nonpool.shape[0], 128)
        self.wn_pad = _pad2d(w_nonpool.astype(jnp.bfloat16),
                             self.k_pad, self.n_pad)
        if w_pool is not None:
            self.din_pad = _round_up(dim_in, 128)
            self.wp_pad = _pad2d(w_pool.astype(jnp.bfloat16),
                                 self.din_pad, self.n_pad)
        else:
            self.din_pad = None
            self.wp_pad = None

    # --- pooled bias: one fused pallas_call, computed once per forward ------
    def _pool_bias(self, x):
        n_rows, _ = x.shape
        tr = min(_round_up(n_rows, 8), 256)
        rows_pad = _round_up(n_rows, tr)
        x_p = _pad2d(x, rows_pad, self.din_pad)
        scale = (1.0 / n_rows) if self.normalize else 1.0
        kernel = functools.partial(_pool_bias_kernel, scale=scale)
        est = (self.din_pad * self.n_pad * 2 + 2 * tr * self.din_pad * 4
               + self.din_pad * 4 + 2 * self.n_pad * 4)
        return pl.pallas_call(
            kernel,
            out_shape=jax.ShapeDtypeStruct((1, self.n_pad), jnp.float32),
            grid=(rows_pad // tr,),
            in_specs=[pl.BlockSpec((tr, self.din_pad), lambda r: (r, 0)),
                      pl.BlockSpec((self.din_pad, self.n_pad),
                                   lambda r: (0, 0))],          # resident w_pool
            out_specs=pl.BlockSpec((1, self.n_pad), lambda r: (0, 0)),
            scratch_shapes=[pltpu.VMEM((1, self.din_pad), jnp.float32)],
            compiler_params=pltpu.CompilerParams(
                dimension_semantics=("arbitrary",),
                vmem_limit_bytes=_vmem_limit(est)),
        )(x_p, self.wp_pad)

    # --- forward -------------------------------------------------------------
    def __call__(self, x, indices=None):
        assert x.ndim == 2
        if self.ord_out == 1:
            assert indices is None
            x_nonpool = x
        else:
            assert indices is not None and indices.ndim == 2
            assert indices.shape[1] == self.ord_out
            b, k = indices.shape
            # TODO(synk): pull this row gather into the matmul kernel via
            # PrefetchScalarGridSpec(num_scalar_prefetch=1) + per-row DMA so the
            # [B, k*dim_in] slab never round-trips through HBM.
            x_nonpool = jnp.take(x.astype(jnp.bfloat16), indices,
                                 axis=0).reshape(b, k * self.dim_in)

        if self.cfg == 'light':
            return _matmul(x_nonpool, self.wn_pad, out_dtype=x.dtype,
                           n_out=self.dim_out)
        bias = self._pool_bias(x)
        return _matmul(x_nonpool, self.wn_pad, bias=bias, out_dtype=x.dtype,
                       n_out=self.dim_out)


# ------------------------------------------------ pure-JAX reference check --
def _ref_forward(mod, x, indices=None):
    """Reference with the same bf16-operand / f32-accumulation semantics."""
    def mm(a, b):
        return jnp.dot(a.astype(jnp.bfloat16), b.astype(jnp.bfloat16),
                       preferred_element_type=jnp.float32)

    if mod.ord_out == 1:
        xn = x
    else:
        b, k = indices.shape
        xn = jnp.take(x, indices, axis=0).reshape(b, k * mod.dim_in)
    if mod.cfg == 'light':
        return mm(xn, mod.weight).astype(x.dtype)
    pool = (jnp.mean(x, axis=0, keepdims=True) if mod.normalize
            else jnp.sum(x, axis=0, keepdims=True))
    out = mm(xn, mod.weight[:-mod.dim_in]) + mm(pool, mod.weight[-mod.dim_in:])
    return out.astype(x.dtype)


# ----------------------------------------------------------------------------
if __name__ == "__main__":
    key = jax.random.PRNGKey(0)
    k_x, k_w1, k_w2, k_w3, k_idx = jax.random.split(key, 5)

    N, D_IN, D_OUT = 8, 32, 32
    x = jax.random.normal(k_x, (N, D_IN), dtype=jnp.float32)

    # Case 1: 1 -> 1, cfg='default', normalize=False (sum pooling)
    mod1 = WeightPallas(1, 1, D_IN, D_OUT, cfg='default', normalize=False,
                        key=k_w1)
    out1 = jax.block_until_ready(mod1(x))
    ref1 = _ref_forward(mod1, x)
    assert out1.shape == (N, D_OUT)
    assert jnp.allclose(out1, ref1, atol=2e-2, rtol=2e-2)

    # Case 2: 1 -> 1, cfg='light'
    mod2 = WeightPallas(1, 1, D_IN, D_OUT, cfg='light', normalize=False,
                        key=k_w2)
    out2 = jax.block_until_ready(mod2(x))
    ref2 = _ref_forward(mod2, x)
    assert out2.shape == (N, D_OUT)
    assert jnp.allclose(out2, ref2, atol=2e-2, rtol=2e-2)

    # Case 3: 1 -> k (k=2), cfg='default', normalize=True (mean pooling)
    B, K = 6, 2
    mod3 = WeightPallas(1, K, D_IN, D_OUT, cfg='default', normalize=True,
                        key=k_w3)
    indices = jax.random.randint(k_idx, (B, K), 0, N, dtype=jnp.int32)
    out3 = jax.block_until_ready(mod3(x, indices))
    ref3 = _ref_forward(mod3, x, indices)
    assert out3.shape == (B, D_OUT)
    assert jnp.allclose(out3, ref3, atol=2e-2, rtol=2e-2)

    print("KERNEL_OK")
</pallas_src>

<mosaic_0001>
module attributes {stable_mosaic.version = 11 : i64} {
  func.func @_pool_bias_kernel(%arg0: i32, %arg1: memref<8x128xf32, #tpu.memory_space<vmem>>, %arg2: memref<128x128xbf16, #tpu.memory_space<vmem>>, %arg3: memref<1x128xf32, #tpu.memory_space<vmem>>, %arg4: memref<1x128xf32, #tpu.memory_space<vmem>>) attributes {dimension_semantics = [#tpu.dimension_semantics<arbitrary>], iteration_bounds = array<i64: 1>, scalar_prefetch = 0 : i64, scratch_operands = 1 : i64, tpu.core_type = #tpu.core_type<tc>, window_params = [{transform_indices = @transform_0, window_bounds = array<i64: 8, 128>}, {pipeline_mode = #tpu.pipeline_mode<synchronous>, transform_indices = @transform_1, window_bounds = array<i64: 128, 128>}, {pipeline_mode = #tpu.pipeline_mode<synchronous>, transform_indices = @transform_2, window_bounds = array<i64: 1, 128>}]} {
    %c0_i32 = arith.constant 0 : i32
    %0 = arith.cmpi eq, %arg0, %c0_i32 : i32
    %1 = arith.extui %0 : i1 to i32
    %c0_i32_0 = arith.constant 0 : i32
    %2 = arith.cmpi ne, %1, %c0_i32_0 : i32
    scf.if %2 {
      %cst_8 = arith.constant 0.000000e+00 : f32
      %12 = vector.broadcast %cst_8 : f32 to vector<1x128xf32>
      %c0_9 = arith.constant 0 : index
      %c0_10 = arith.constant 0 : index
      %13 = vector.load %arg4[%c0_9, %c0_10] : memref<1x128xf32, #tpu.memory_space<vmem>>, vector<1x128xf32>
      tpu.vector_store %arg4[%c0_9, %c0_10], %12 {strides = array<i32>} : memref<1x128xf32, #tpu.memory_space<vmem>>, vector<1x128xf32>,
    } else {
    }
    %c0 = arith.constant 0 : index
    %c0_1 = arith.constant 0 : index
    %3 = vector.load %arg4[%c0, %c0_1] : memref<1x128xf32, #tpu.memory_space<vmem>>, vector<1x128xf32>
    %c0_2 = arith.constant 0 : index
    %c0_3 = arith.constant 0 : index
    %4 = vector.load %arg1[%c0_2, %c0_3] : memref<8x128xf32, #tpu.memory_space<vmem>>, vector<8x128xf32>
    %cst = arith.constant dense<0.000000e+00> : vector<128xf32>
    %5 = vector.multi_reduction <add>, %4, %cst [0] : vector<8x128xf32> to vector<128xf32>
    %6 = vector.shape_cast %5 : vector<128xf32> to vector<1x128xf32>
    %7 = arith.addf %3, %6 : vector<1x128xf32>
    %c0_4 = arith.constant 0 : index
    %c0_5 = arith.constant 0 : index
    %8 = vector.load %arg4[%c0_4, %c0_5] : memref<1x128xf32, #tpu.memory_space<vmem>>, vector<1x128xf32>
    tpu.vector_store %arg4[%c0_4, %c0_5], %7 {strides = array<i32>} : memref<1x128xf32, #tpu.memory_space<vmem>>, vector<1x128xf32>,
    %c0_i32_6 = arith.constant 0 : i32
    %9 = arith.cmpi eq, %arg0, %c0_i32_6 : i32
    %10 = arith.extui %9 : i1 to i32
    %c0_i32_7 = arith.constant 0 : i32
    %11 = arith.cmpi ne, %10, %c0_i32_7 : i32
    scf.if %11 {
      %c0_8 = arith.constant 0 : index
      %c0_9 = arith.constant 0 : index
      %12 = vector.load %arg4[%c0_8, %c0_9] : memref<1x128xf32, #tpu.memory_space<vmem>>, vector<1x128xf32>
      %cst_10 = arith.constant 1.000000e+00 : f32
      %13 = vector.broadcast %cst_10 : f32 to vector<1x128xf32>
      %14 = arith.mulf %12, %13 : vector<1x128xf32>
      %15 = arith.truncf %14 : vector<1x128xf32> to vector<1x128xbf16>
      %16 = vector.shape_cast %15 : vector<1x128xbf16> to vector<1x128xbf16>
      %17 = vector.broadcast %16 : vector<1x128xbf16> to vector<8x128xbf16>
      %c0_11 = arith.constant 0 : index
      %c0_12 = arith.constant 0 : index
      %18 = vector.load %arg2[%c0_11, %c0_12] : memref<128x128xbf16, #tpu.memory_space<vmem>>, vector<128x128xbf16>
      %cst_13 = arith.constant dense<0.000000e+00> : vector<8x128xf32>
      %19 = tpu.matmul %17, %18, %cst_13 {dimension_numbers = #tpu.dot_dimension_numbers<[1], [0], [0], [1], [0, 0, 1, 1], [], []>} : vector<8x128xbf16>, vector<128x128xbf16>, vector<8x128xf32> -> vector<8x128xf32>
      %20 = vector.extract_strided_slice %19 {offsets = [0, 0], sizes = [1, 128], strides = [1, 1]} : vector<8x128xf32> to vector<1x128xf32>
      %c0_14 = arith.constant 0 : index
      %c0_15 = arith.constant 0 : index
      %21 = vector.load %arg3[%c0_14, %c0_15] : memref<1x128xf32, #tpu.memory_space<vmem>>, vector<1x128xf32>
      tpu.vector_store %arg3[%c0_14, %c0_15], %20 {strides = array<i32>} : memref<1x128xf32, #tpu.memory_space<vmem>>, vector<1x128xf32>,
    } else {
    }
    return
  }
  func.func @transform_0(%arg0: i32) -> (i32, i32) {
    %c0_i32 = arith.constant 0 : i32
    %c0_i32_0 = arith.constant 0 : i32
    return %arg0, %c0_i32 : i32, i32
  }
  func.func @transform_1(%arg0: i32) -> (i32, i32) {
    %c0_i32 = arith.constant 0 : i32
    %c0_i32_0 = arith.constant 0 : i32
    %c0_i32_1 = arith.constant 0 : i32
    return %c0_i32, %c0_i32_0 : i32, i32
  }
  func.func @transform_2(%arg0: i32) -> (i32, i32) {
    %c0_i32 = arith.constant 0 : i32
    %c0_i32_0 = arith.constant 0 : i32
    %c0_i32_1 = arith.constant 0 : i32
    return %c0_i32, %c0_i32_0 : i32, i32
  }
}

</mosaic_0001>

<bundles_post_ra>
// kernel: tpu_custom_call.1
= control target key start
LH: loop header
LB: loop body
LE: loop exit
PB: predicated region body
PF: predicated region fallthrough
CT: control target
= control target key end

     0   :  { %7 = vsyncpa [#allocation4], 0  ;;  %s336_s0 = inlined_call_operand.hbm [shape: f32[8,128], index: 0, kind: input, shape index: {}]   ;;  %s337_s1 = inlined_call_operand.hbm [shape: bf16[128,128], index: 1, kind: input, shape index: {}]   ;;  %s338_s2 = inlined_call_operand.hbm [shape: f32[1,128], index: 2, kind: output, shape index: {}]  }
   0x1   :  { %8 = vsyncpa [#allocation7], 0 }
   0x2   :  { %9 = vsyncpa [#allocation5], 0  ;;  %s305_s9 = smov [#allocation3]   ;;  %s306_s11 = smov [#allocation6]  }
   0x3   :  { %s16_s10 = sshll.u32 %s305_s9, 4  ;;  %s25_s12 = sshll.u32 %s306_s11, 4  ;;  %s17_s10 = int_to_ptr.vmem [resolvable:$true] %s16_s10  ;;  %s26_s12 = int_to_ptr.vmem [resolvable:$true] %s25_s12 }
   0x4   :  { %s247_s13 = scalar_lea.vmem %s17_s10, 128  ;;  %p252_p1 = scmp.lt.s32.totalorder %s17_s10, %s17_s10 }
   0x5   :  { %p248_p0 = scmp.ne.s32.totalorder %s17_s10, %s247_s13  ;;  %p253_p2 = scmp.lt.s32.totalorder %s247_s13, %s247_s13 }
   0x7   :  { %p254_p3 = por %p253_p2, %p252_p1 }
   0x9   :  { %p255_p4 = pnand %p254_p3, %p248_p0 }
   0xb   :  { %258 = shalt.err (!%p255_p4)
}
   0xc   :  { %19 = dma.hbm_to_vmem [thread:$0]  %s336_s0, 128, %s17_s10, [#allocation4]  }
   0xd   :  { %s267_s16 = scalar_lea.vmem %s26_s12, 1024  ;;  %p272_p6 = scmp.lt.s32.totalorder %s26_s12, %s26_s12 }
   0xe   :  { %p268_p5 = scmp.ne.s32.totalorder %s26_s12, %s267_s16  ;;  %p273_p7 = scmp.lt.s32.totalorder %s267_s16, %s267_s16 }
  0x10   :  { %p274_p8 = por %p273_p7, %p272_p6 }
  0x12   :  { %p275_p9 = pnand %p274_p8, %p268_p5 }
  0x14   :  { %278 = shalt.err (!%p275_p9)
}
  0x15   :  { %s307_s17 = smov 64   ;;  %s308_s18 = smov 4  }
  0x16   :  { %31 = dma.hbm_to_vmem [thread:$0]  %s337_s1, 1024, %s26_s12, [#allocation7], %s307_s17, %s307_s17, %s308_s18  }
  0x17   :  { %299 = dma.done.wait [#allocation4], 128  }
  0x18   :  { %300 = vsyncadd [#allocation4], 4294967168 }
  0x19   :  { %301 = dma.done.wait [#allocation7], 1024  }
  0x1a   :  { %302 = vsyncadd [#allocation7], 4294966272  ;;  %v309_v0 = vmov 0.0   ;;  %vm310_vm0 = vmmov 0   ;;  %v231_v1 = vld [vmem:[#allocation6 + $0x38] sm:$0xff]   ;;  %v232_v2 = vld [vmem:[#allocation6 + $0x30] sm:$0xff]   ;;  %v62_v17 = vlaneseq }
  0x1b   :  { %204 = vmatprep.subr.bf16.mxu0 %v309_v0  ;;  %43 = vst [vmem:[#allocation2] sm:$0x1] %v309_v0  ;;  %220 = vmatprep.mubr.msk.bf16.mxu0 %vm310_vm0, %v309_v0  ;;  %v233_v3 = vld [vmem:[#allocation6 + $0x28] sm:$0xff]   ;;  %v45_v4 = vld [vmem:[#allocation3] sm:$0xff]  ;;  %v234_v6 = vld [vmem:[#allocation6 + $0x20] sm:$0xff]   ;;  %s311_s0 = smov [#allocation8]  }
  0x1c   :  { %205 = vmatpush3.bf16.msra.mxu0 %v231_v1  ;;  %v46_v5 = vrot.slane %v45_v4, 4  ;;  %v235_v9 = vld [vmem:[#allocation6 + $0x18] sm:$0xff]   ;;  %v236_v12 = vld [vmem:[#allocation6 + $0x10] sm:$0xff]   ;;  %v237_v16 = vld [vmem:[#allocation6 + $0x8] sm:$0xff]   ;;  %v63_v19 = vshrl.u32 %v62_v17, 7  ;;  %s177_s1 = sshll.u32 %s311_s0, 4  ;;  %s178_s1 = int_to_ptr.vmem [resolvable:$true] %s177_s1 }
  0x1d   :  { %206 = vmatprep.subr.bf16.mxu0 %v309_v0  ;;  %v238_v18 = vld [vmem:[#allocation6] sm:$0xff]   ;;  %s279_s21 = scalar_lea.vmem %s178_s1, 16  ;;  %s283_s22 = scalar_lea.vmem %s178_s1, 32 }
  0x1e   :  { %v47_v7 = vadd.f32 %v46_v5, %v45_v4  ;;  %v64_v22 = vsub.s32 0, %v63_v19  ;;  %p280_p10 = scmp.ne.s32.totalorder %s178_s1, %s279_s21  ;;  %p284_p11 = scmp.lt.s32.totalorder %s178_s1, %s178_s1 }
  0x1f   :  { %p285_p12 = scmp.lt.s32.totalorder %s283_s22, %s279_s21 }
  0x20   :  { %207 = vmatpush3.bf16.msra.mxu0 %v232_v2  ;;  %v48_v8 = vrot.slane %v47_v7, 2 }
  0x21   :  { %208 = vmatprep.subr.bf16.mxu0 %v309_v0  ;;  %p286_p13 = por %p285_p12, %p284_p11 }
  0x22   :  { %v49_v10 = vadd.f32 %v48_v8, %v47_v7  ;;  %v44_v13 = vld [vmem:[#allocation2] sm:$0x1] }
  0x23   :  { %p287_p0 = pnand %p286_p13, %p280_p10 }
  0x24   :  { %209 = vmatpush3.bf16.msra.mxu0 %v233_v3  ;;  %v50_v11 = vrot.slane %v49_v10, 1 }
  0x25   :  { %210 = vmatprep.subr.bf16.mxu0 %v309_v0 }
  0x26   :  { %v51_v14 = vadd.f32 %v50_v11, %v49_v10 }
  0x28   :  { %211 = vmatpush3.bf16.msra.mxu0 %v234_v6  ;;  %v52_v15 = vadd.f32 %v51_v14, %v44_v13 }
  0x29   :  { %212 = vmatprep.subr.bf16.mxu0 %v309_v0 }
  0x2a   :  { %53 = vst [vmem:[#allocation2] sm:$0x1] %v52_v15 }
  0x2c   :  { %213 = vmatpush3.bf16.msra.mxu0 %v235_v9 }
  0x2d   :  { %214 = vmatprep.subr.bf16.mxu0 %v309_v0 }
  0x30   :  { %215 = vmatpush3.bf16.msra.mxu0 %v236_v12 }
  0x31   :  { %216 = vmatprep.subr.bf16.mxu0 %v309_v0  ;;  %v57_v20 = vld [vmem:[#allocation2] sm:$0x1] }
  0x32   :  { %v58_v21 = vpack.c.bf16 %v57_v20, %v57_v20 }
  0x34   :  { %217 = vmatpush3.bf16.msra.mxu0 %v237_v16  ;;  %v60_v23 = vpack.i.b16 %v58_v21, %v58_v21 }
  0x35   :  { %218 = vmatprep.subr.bf16.mxu0 %v309_v0 }
  0x36   :  { %v65_v24 = vrot.slane %v60_v23, %v64_v22 }
  0x38   :  { %219 = vmatpush3.bf16.msra.mxu0 %v238_v18 }
  0x3b   :  { %221 = vmatmul.mubr.bf16.vlgmr.msra.gmra.mxu0 %v65_v24 }
  0xfb   :  { %v164_v25 = vpop.f32.mrf.mxu0 }
  0xfc   :  { %170 = vst [vmem:[#allocation8] sm:$0x1] %v164_v25 }
  0xfd   :  { %v222_v26 = vpop.f32.mrf.mxu0 }
  0xfe   :  { %290 = shalt.err (!%p287_p0)
}
  0xff   :  { %180 = dma.vmem_to_hbm [thread:$0]  %s178_s1, 16, %s338_s2, [#allocation5]   ;;  %v167_v27 = vpop.f32.mrf.mxu0 }
 0x101   :  { %v223_v28 = vpop.f32.mrf.mxu0 }
 0x102   :  { %303 = dma.done.wait [#allocation5], 16  }
 0x103   :  { %304 = vsyncadd [#allocation5], 4294967280 }
 0x104   :  { %184 = vsyncpa [#allocation4], 1 }
 0x105   :  { %185 = vsyncpa [#allocation7], 1 }
 0x106   :  { %186 = vsyncpa [#allocation5], 1 }

</bundles_post_ra>
